<compile_context>
chip_gen: v5e
topology: v5e:2x2
jax: 0.10.0
libtpu: 0.0.40
codegen_flags: <defaults>
</compile_context>

<pallas_src>
import jax
import jax.numpy as jnp
from jax.experimental import pallas as pl
from jax.experimental.pallas import tpu as pltpu

_LANES = 128
_MAX_TILE_LANES = 16 * 1024      # boxes per grid step (512 KiB per f32 stream @ C=8)


def _round_up(x, m):
    return ((x + m - 1) // m) * m


def _make_kernel(thresholds, values):
    """Kernel body with the OHEM reweight table baked in as constants."""

    def kernel(gap_ref, pred_ref, target_ref, out_ref, acc_ref):
        # --- init accumulator at the start of each outer slice ---------------
        @pl.when(pl.program_id(1) == 0)
        def _init():
            acc_ref[...] = jnp.zeros_like(acc_ref)

        # --- per-tile work: pure VPU ------------------------------------------
        diff = pred_ref[...].astype(jnp.float32) - target_ref[...].astype(jnp.float32)
        sq = diff * diff                                  # MSE, reduction='none'

        g = gap_ref[...].astype(jnp.float32)              # (1, tw): once per box
        w = jnp.ones_like(g)
        for thr, val in zip(thresholds, values):          # ascending thresholds,
            w = jnp.where(g > jnp.float32(thr), jnp.float32(val), w)  # later wins

        acc_ref[...] += sq * w                            # (1,tw) sublane-broadcast

        # --- finalize: one cross-lane reduce per outer slice ------------------
        @pl.when(pl.program_id(1) == pl.num_programs(1) - 1)
        def _fini():
            out_ref[...] = jnp.full(out_ref.shape, jnp.sum(acc_ref[...]), jnp.float32)

    return kernel


def ohem_reg_loss(pred, target, gap, weight_dict):
    """Pallas TPU implementation of OHEMRegLoss.forward.

    pred, target : (..., C) float      elementwise MSE
    gap          : pred.shape[:-1]     drives the OHEM reweighting
    weight_dict  : {threshold: weight} compile-time constants (loss_cfg)
    Returns a 0-d float32 array (the mean loss).
    """
    assert target.shape == pred.shape
    assert gap.shape == pred.shape[:-1]

    wd = {float(k): float(v) for k, v in weight_dict.items()}
    thresholds = sorted(wd)                      # ascending, as in reweight()
    values = [wd[t] for t in thresholds]

    C = int(pred.shape[-1])
    M = int(gap.size)                            # number of boxes
    n_elem = int(pred.size)                      # true element count for the mean

    # --- tiling: box axis on lanes, code axis on sublanes ---------------------
    tw = min(_MAX_TILE_LANES, _round_up(M, _LANES))        # tile width (boxes)
    n_tiles = pl.cdiv(M, tw)
    n_outer = 2 if n_tiles >= 2 else 1                     # megacore split (v7x)
    n_inner = pl.cdiv(n_tiles, n_outer)
    l_pad = n_outer * n_inner * tw

    # Layout plumbing only (folded into the padding copy): (..., C) -> (C, L).
    # Zero-padded tail gives diff == 0, so it contributes nothing to the sum.
    def to_cxl(x):
        x2 = x.reshape(M, C).T                             # (C, M)
        if l_pad != M:
            x2 = jnp.pad(x2, ((0, 0), (0, l_pad - M)))
        return x2

    pred_s = to_cxl(pred)
    target_s = to_cxl(target)
    gap_s = gap.reshape(-1)
    if l_pad != M:
        gap_s = jnp.pad(gap_s, (0, l_pad - M))
    gap_s = gap_s.reshape(1, l_pad)

    kernel = _make_kernel(thresholds, values)

    partials = pl.pallas_call(
        kernel,
        out_shape=jax.ShapeDtypeStruct((n_outer, 8, _LANES), jnp.float32),
        grid=(n_outer, n_inner),
        in_specs=[
            pl.BlockSpec((1, tw), lambda o, i: (0, o * n_inner + i)),
            pl.BlockSpec((C, tw), lambda o, i: (0, o * n_inner + i)),
            pl.BlockSpec((C, tw), lambda o, i: (0, o * n_inner + i)),
        ],
        out_specs=pl.BlockSpec((1, 8, _LANES), lambda o, i: (o, 0, 0)),
        scratch_shapes=[pltpu.VMEM((C, tw), jnp.float32)],
        compiler_params=pltpu.CompilerParams(
            dimension_semantics=("parallel", "arbitrary")),
    )(gap_s, pred_s, target_s)

    total = jnp.sum(partials[:, 0, 0])
    return (total / jnp.float32(n_elem)).astype(jnp.float32)


def _reference_forward(pred, target, gap, weight_dict):
    """Pure-JAX transcription of the PyTorch forward (for verification)."""
    wd = {float(k): float(v) for k, v in weight_dict.items()}
    loss = (pred.astype(jnp.float32) - target.astype(jnp.float32)) ** 2
    w = jnp.ones(gap.shape, jnp.float32)
    for thr in sorted(wd):
        w = jnp.where(gap > thr, jnp.float32(wd[thr]), w)
    return jnp.mean(loss * w[..., None])


if __name__ == "__main__":
    weight_dict = {0.5: 2.0, 1.0: 5.0, 2.0: 10.0}          # loss_cfg['WEIGHT_DICT']
    key = jax.random.PRNGKey(0)

    # Case 1: small shapes consistent with the module (batch=2, 64 boxes, code 8).
    B, N, C = 2, 64, 8
    k1, k2, k3, key = jax.random.split(key, 4)
    pred = jax.random.normal(k1, (B, N, C), dtype=jnp.float32)
    target = jax.random.normal(k2, (B, N, C), dtype=jnp.float32)
    gap = jax.random.uniform(k3, (B, N), dtype=jnp.float32, minval=0.0, maxval=3.0)

    out = jax.block_until_ready(ohem_reg_loss(pred, target, gap, weight_dict))
    ref = _reference_forward(pred, target, gap, weight_dict)
    assert out.shape == ()
    assert jnp.allclose(out, ref, atol=1e-5, rtol=1e-5), (float(out), float(ref))

    # Case 2: enough boxes to exercise the tiled grid, the accumulator
    # init/accumulate/finalize path and the "parallel" outer split (~1 MiB).
    B2, N2, C2 = 2, 17000, 8
    k1, k2, k3, key = jax.random.split(key, 4)
    pred2 = jax.random.normal(k1, (B2, N2, C2), dtype=jnp.float32)
    target2 = jax.random.normal(k2, (B2, N2, C2), dtype=jnp.float32)
    gap2 = jax.random.uniform(k3, (B2, N2), dtype=jnp.float32, minval=0.0, maxval=3.0)

    out2 = jax.block_until_ready(ohem_reg_loss(pred2, target2, gap2, weight_dict))
    ref2 = _reference_forward(pred2, target2, gap2, weight_dict)
    assert jnp.allclose(out2, ref2, atol=1e-5, rtol=1e-5), (float(out2), float(ref2))

    print("KERNEL_OK")
</pallas_src>

<mosaic_0001>
module attributes {stable_mosaic.version = 11 : i64} {
  func.func @kernel(%arg0: i32, %arg1: i32, %arg2: memref<1x128xf32, #tpu.memory_space<vmem>>, %arg3: memref<8x128xf32, #tpu.memory_space<vmem>>, %arg4: memref<8x128xf32, #tpu.memory_space<vmem>>, %arg5: memref<1x8x128xf32, #tpu.memory_space<vmem>>, %arg6: memref<8x128xf32, #tpu.memory_space<vmem>>) attributes {dimension_semantics = [#tpu.dimension_semantics<parallel>, #tpu.dimension_semantics<arbitrary>], iteration_bounds = array<i64: 1, 1>, scalar_prefetch = 0 : i64, scratch_operands = 1 : i64, tpu.core_type = #tpu.core_type<tc>, window_params = [{transform_indices = @transform_0, window_bounds = array<i64: 1, 128>}, {transform_indices = @transform_1, window_bounds = array<i64: 8, 128>}, {transform_indices = @transform_2, window_bounds = array<i64: 8, 128>}, {transform_indices = @transform_3, window_bounds = array<i64: 1, 8, 128>}]} {
    %c0_i32 = arith.constant 0 : i32
    %0 = arith.cmpi eq, %arg1, %c0_i32 : i32
    %1 = arith.extui %0 : i1 to i32
    %c0_i32_0 = arith.constant 0 : i32
    %2 = arith.cmpi ne, %1, %c0_i32_0 : i32
    scf.if %2 {
      %cst_18 = arith.constant 0.000000e+00 : f32
      %29 = vector.broadcast %cst_18 : f32 to vector<8x128xf32>
      %c0_19 = arith.constant 0 : index
      %c0_20 = arith.constant 0 : index
      %30 = vector.load %arg6[%c0_19, %c0_20] : memref<8x128xf32, #tpu.memory_space<vmem>>, vector<8x128xf32>
      tpu.vector_store %arg6[%c0_19, %c0_20], %29 {strides = array<i32>} : memref<8x128xf32, #tpu.memory_space<vmem>>, vector<8x128xf32>,
    } else {
    }
    %c0 = arith.constant 0 : index
    %c0_1 = arith.constant 0 : index
    %3 = vector.load %arg3[%c0, %c0_1] : memref<8x128xf32, #tpu.memory_space<vmem>>, vector<8x128xf32>
    %c0_2 = arith.constant 0 : index
    %c0_3 = arith.constant 0 : index
    %4 = vector.load %arg4[%c0_2, %c0_3] : memref<8x128xf32, #tpu.memory_space<vmem>>, vector<8x128xf32>
    %5 = arith.subf %3, %4 : vector<8x128xf32>
    %6 = arith.mulf %5, %5 : vector<8x128xf32>
    %c0_4 = arith.constant 0 : index
    %c0_5 = arith.constant 0 : index
    %7 = vector.load %arg2[%c0_4, %c0_5] : memref<1x128xf32, #tpu.memory_space<vmem>>, vector<1x128xf32>
    %cst = arith.constant 1.000000e+00 : f32
    %8 = vector.broadcast %cst : f32 to vector<1x128xf32>
    %cst_6 = arith.constant 5.000000e-01 : f32
    %9 = vector.broadcast %cst_6 : f32 to vector<1x128xf32>
    %10 = arith.cmpf ogt, %7, %9 : vector<1x128xf32>
    %cst_7 = arith.constant 2.000000e+00 : f32
    %11 = vector.broadcast %cst_7 : f32 to vector<1x128xf32>
    %12 = arith.select %10, %11, %8 : vector<1x128xi1>, vector<1x128xf32>
    %cst_8 = arith.constant 1.000000e+00 : f32
    %13 = vector.broadcast %cst_8 : f32 to vector<1x128xf32>
    %14 = arith.cmpf ogt, %7, %13 : vector<1x128xf32>
    %cst_9 = arith.constant 5.000000e+00 : f32
    %15 = vector.broadcast %cst_9 : f32 to vector<1x128xf32>
    %16 = arith.select %14, %15, %12 : vector<1x128xi1>, vector<1x128xf32>
    %cst_10 = arith.constant 2.000000e+00 : f32
    %17 = vector.broadcast %cst_10 : f32 to vector<1x128xf32>
    %18 = arith.cmpf ogt, %7, %17 : vector<1x128xf32>
    %cst_11 = arith.constant 1.000000e+01 : f32
    %19 = vector.broadcast %cst_11 : f32 to vector<1x128xf32>
    %20 = arith.select %18, %19, %16 : vector<1x128xi1>, vector<1x128xf32>
    %c0_12 = arith.constant 0 : index
    %c0_13 = arith.constant 0 : index
    %21 = vector.load %arg6[%c0_12, %c0_13] : memref<8x128xf32, #tpu.memory_space<vmem>>, vector<8x128xf32>
    %22 = vector.broadcast %20 : vector<1x128xf32> to vector<8x128xf32>
    %23 = arith.mulf %6, %22 : vector<8x128xf32>
    %24 = arith.addf %21, %23 : vector<8x128xf32>
    %c0_14 = arith.constant 0 : index
    %c0_15 = arith.constant 0 : index
    %25 = vector.load %arg6[%c0_14, %c0_15] : memref<8x128xf32, #tpu.memory_space<vmem>>, vector<8x128xf32>
    tpu.vector_store %arg6[%c0_14, %c0_15], %24 {strides = array<i32>} : memref<8x128xf32, #tpu.memory_space<vmem>>, vector<8x128xf32>,
    %c0_i32_16 = arith.constant 0 : i32
    %26 = arith.cmpi eq, %arg1, %c0_i32_16 : i32
    %27 = arith.extui %26 : i1 to i32
    %c0_i32_17 = arith.constant 0 : i32
    %28 = arith.cmpi ne, %27, %c0_i32_17 : i32
    scf.if %28 {
      %c0_18 = arith.constant 0 : index
      %c0_19 = arith.constant 0 : index
      %29 = vector.load %arg6[%c0_18, %c0_19] : memref<8x128xf32, #tpu.memory_space<vmem>>, vector<8x128xf32>
      %30 = vector.shape_cast %29 : vector<8x128xf32> to vector<1x8x128xf32>
      %cst_20 = arith.constant dense<0.000000e+00> : vector<1xf32>
      %31 = vector.multi_reduction <add>, %30, %cst_20 [1, 2] : vector<1x8x128xf32> to vector<1xf32>
      %32 = vector.shape_cast %31 : vector<1xf32> to vector<1x1x1xf32>
      %33 = vector.extract %32[0, 0, 0] : f32 from vector<1x1x1xf32>
      %34 = vector.broadcast %33 : f32 to vector<1x8x128xf32>
      %c0_21 = arith.constant 0 : index
      %c0_22 = arith.constant 0 : index
      %c0_23 = arith.constant 0 : index
      %35 = vector.load %arg5[%c0_21, %c0_22, %c0_23] : memref<1x8x128xf32, #tpu.memory_space<vmem>>, vector<1x8x128xf32>
      tpu.vector_store %arg5[%c0_21, %c0_22, %c0_23], %34 {strides = array<i32>} : memref<1x8x128xf32, #tpu.memory_space<vmem>>, vector<1x8x128xf32>,
    } else {
    }
    return
  }
  func.func @transform_0(%arg0: i32, %arg1: i32) -> (i32, i32) {
    %c1_i32 = arith.constant 1 : i32
    %0 = arith.muli %arg0, %c1_i32 : i32
    %1 = arith.addi %0, %arg1 : i32
    %c0_i32 = arith.constant 0 : i32
    %c0_i32_0 = arith.constant 0 : i32
    return %c0_i32, %1 : i32, i32
  }
  func.func @transform_1(%arg0: i32, %arg1: i32) -> (i32, i32) {
    %c1_i32 = arith.constant 1 : i32
    %0 = arith.muli %arg0, %c1_i32 : i32
    %1 = arith.addi %0, %arg1 : i32
    %c0_i32 = arith.constant 0 : i32
    %c0_i32_0 = arith.constant 0 : i32
    return %c0_i32, %1 : i32, i32
  }
  func.func @transform_2(%arg0: i32, %arg1: i32) -> (i32, i32) {
    %c1_i32 = arith.constant 1 : i32
    %0 = arith.muli %arg0, %c1_i32 : i32
    %1 = arith.addi %0, %arg1 : i32
    %c0_i32 = arith.constant 0 : i32
    %c0_i32_0 = arith.constant 0 : i32
    return %c0_i32, %1 : i32, i32
  }
  func.func @transform_3(%arg0: i32, %arg1: i32) -> (i32, i32, i32) {
    %c0_i32 = arith.constant 0 : i32
    %c0_i32_0 = arith.constant 0 : i32
    %c0_i32_1 = arith.constant 0 : i32
    return %arg0, %c0_i32, %c0_i32_0 : i32, i32, i32
  }
}

</mosaic_0001>

<bundles_post_ra>
// kernel: tpu_custom_call.1
= control target key start
LH: loop header
LB: loop body
LE: loop exit
PB: predicated region body
PF: predicated region fallthrough
CT: control target
= control target key end

     0   :  { %8 = vsyncpa [#allocation4], 0  ;;  %s269_s0 = inlined_call_operand.hbm [shape: f32[1,128], index: 0, kind: input, shape index: {}]   ;;  %s270_s1 = inlined_call_operand.hbm [shape: f32[8,128], index: 1, kind: input, shape index: {}]   ;;  %s271_s2 = inlined_call_operand.hbm [shape: f32[8,128], index: 2, kind: input, shape index: {}]   ;;  %s272_s3 = inlined_call_operand.hbm [shape: f32[1,8,128], index: 3, kind: output, shape index: {}]  }
   0x1   :  { %9 = vsyncpa [#allocation7], 0  ;;  %s32_s14 = sshll.u32 %s270_s1, 4  ;;  %s33_s14 = int_to_ptr.hbm [resolvable:$true] %s32_s14 }
   0x2   :  { %10 = vsyncpa [#allocation5], 0  ;;  %s232_s15 = smov [#allocation6]   ;;  %s18_s19 = sshll.u32 %s269_s0, 4  ;;  %s19_s19 = int_to_ptr.hbm [resolvable:$true] %s18_s19 }
   0x3   :  { %s34_s16 = sshll.u32 %s232_s15, 4  ;;  %s233_s20 = smov [#allocation3]   ;;  %s35_s16 = int_to_ptr.vmem [resolvable:$true] %s34_s16 }
   0x4   :  { %37 = dma.hbm_to_vmem [thread:$0]  %s33_s14, 128, %s35_s16, [#allocation7]  }
   0x5   :  { %s20_s21 = sshll.u32 %s233_s20, 4  ;;  %s46_s24 = sshll.u32 %s271_s2, 4  ;;  %s21_s21 = int_to_ptr.vmem [resolvable:$true] %s20_s21  ;;  %s47_s24 = int_to_ptr.hbm [resolvable:$true] %s46_s24 }
   0x6   :  { %23 = dma.hbm_to_vmem [thread:$0]  %s19_s19, 16, %s21_s21, [#allocation4]  }
   0x7   :  { %s234_s1 = smov [#allocation8]  }
   0x8   :  { %s48_s25 = sshll.u32 %s234_s1, 4  ;;  %s49_s25 = int_to_ptr.vmem [resolvable:$true] %s48_s25 }
   0x9   :  { %51 = dma.hbm_to_vmem [thread:$0]  %s47_s24, 128, %s49_s25, [#allocation7]  }
   0xa   :  { %226 = dma.done.wait [#allocation4], 16  }
   0xb   :  { %227 = vsyncadd [#allocation4], 4294967280 }
   0xc   :  { %228 = dma.done.wait [#allocation7], 256  }
   0xd   :  { %229 = vsyncadd [#allocation7], 4294967040  ;;  %v72_v0 = vld [vmem:[#allocation6] sm:$0xff]  ;;  %v73_v1 = vld [vmem:[#allocation8] sm:$0xff]  ;;  %v235_v4 = vmov 1.0   ;;  %s236_s0 = smov [#allocation9]  }
   0xe   :  { %v76_v2 = vld [vmem:[#allocation3] sm:$0x1]  ;;  %v74_v3 = vsub.f32 %v72_v0, %v73_v1  ;;  %s110_s2 = sshll.u32 %s236_s0, 4  ;;  %s112_s28 = sshll.u32 %s272_s3, 4  ;;  %s111_s2 = int_to_ptr.vmem [resolvable:$true] %s110_s2  ;;  %s113_s28 = int_to_ptr.hbm [resolvable:$true] %s112_s28 }
   0xf   :  { %vm77_vm0 = vcmp.gt.f32.partialorder %v76_v2, 0.5  ;;  %vm79_vm1 = vcmp.gt.f32.partialorder %v76_v2, 1.0  ;;  %vm81_vm2 = vcmp.gt.f32.partialorder %v76_v2, 2.0 }
  0x10   :  { %v78_v5 = vsel %vm77_vm0, 2.0, %v235_v4  ;;  %v75_v6 = vmul.f32 %v74_v3, %v74_v3 }
  0x11   :  { %v80_v7 = vsel %vm79_vm1, 5.0, %v78_v5 }
  0x12   :  { %v82_v8 = vsel %vm81_vm2, 10.0, %v80_v7 }
  0x13   :  { %v85_v9 = vperm.slane %v82_v8, 0 }
  0x15   :  { %v87_v10 = vmul.f32 %v85_v9, %v75_v6 }
  0x17   :  { %94 = vadd.xlane.f32.xlu0 %v87_v10 }
  0x8a   :  { %v95_v11 = vpop.xlane.xlu0 %94 }
  0x8b   :  { %v96_v12 = vrot.slane %v95_v11, 4 }
  0x8d   :  { %v97_v13 = vadd.f32 %v96_v12, %v95_v11 }
  0x8f   :  { %v98_v14 = vrot.slane %v97_v13, 2 }
  0x91   :  { %v99_v15 = vadd.f32 %v98_v14, %v97_v13 }
  0x93   :  { %v100_v16 = vrot.slane %v99_v15, 1 }
  0x95   :  { %v101_v17 = vadd.f32 %v100_v16, %v99_v15 }
  0x97   :  { %123 = vpush %v101_v17 }
  0xc8   :  { %s124_s29 = spop %123 }
  0xc9   :  { %v103_v18 = vstv %s124_s29 }
  0xca   :  { %104 = vst [vmem:[#allocation9] sm:$0xff] %v103_v18 }
  0xcb   :  { %115 = dma.vmem_to_hbm [thread:$0]  %s111_s2, 128, %s113_s28, [#allocation5]  }
  0xcc   :  { %230 = dma.done.wait [#allocation5], 128  }
  0xcd   :  { %231 = vsyncadd [#allocation5], 4294967168 }
  0xce   :  { %120 = vsyncpa [#allocation4], 1 }
  0xcf   :  { %121 = vsyncpa [#allocation7], 1 }
  0xd0   :  { %122 = vsyncpa [#allocation5], 1 }

</bundles_post_ra>
